<compile_context>
chip_gen: v7x
topology: tpu7x:2x2x1
jax: 0.10.0
libtpu: 0.0.40
codegen_flags: <defaults>
</compile_context>

<pallas_src>
import functools
import math

import jax
import jax.numpy as jnp
from jax.experimental import pallas as pl
from jax.experimental.pallas import tpu as pltpu

LANE = 128            # lane width / MXU alignment for hidden dims
MAX_BATCH_TILE = 1024  # rows per grid step upper bound (VMEM stays tiny)


def _round_up(x, m):
    return ((x + m - 1) // m) * m


def _choose_batch_tile(batch):
    """Pick (batch_tile, n_tiles): big tiles, even step count for v7x 2-TC balance."""
    if batch <= 8:
        return 8, 1
    n_tiles = max(2, -(-batch // MAX_BATCH_TILE))
    if n_tiles % 2:
        n_tiles += 1  # even step count -> balanced across 2 TensorCores on v7x
    tile = _round_up(-(-batch // n_tiles), 8)
    return tile, n_tiles


# ---------------------------------------------------------------------------
# Fused MLP kernel: whole network per batch tile, intermediates stay on-chip.
# refs = (x_ref, w0, b0, w1, b1, ..., w_{L-1}, b_{L-1}, o_ref)
# ---------------------------------------------------------------------------
def _fused_mlp_kernel(*refs, n_layers):
    x_ref = refs[0]
    o_ref = refs[-1]
    layer_refs = refs[1:-1]

    x = x_ref[...].astype(jnp.float32)
    for i in range(n_layers):
        w = layer_refs[2 * i][...]
        b = layer_refs[2 * i + 1][...].astype(jnp.float32)
        # If weights are stored bf16, cast only the MXU operand (activation math
        # stays f32 -> safe on v5e, saves weight DMA on v6e/v7x).
        xm = x.astype(w.dtype) if w.dtype != x.dtype else x
        y = jnp.dot(xm, w, preferred_element_type=jnp.float32) + b
        if i < n_layers - 1:
            # LeakyReLU(0.2)
            x = jnp.where(y > 0, y, jnp.float32(0.2) * y)
        else:
            # final ReLU
            x = jnp.maximum(y, jnp.float32(0.0))
    o_ref[...] = x.astype(o_ref.dtype)


# ---------------------------------------------------------------------------
# Parameter init (PyTorch-like uniform) and one-time padding.
# Only hidden feature dims are padded to 128; the noise input dim and the
# final output dim are kept at their true widths (legal BlockSpecs, less DMA).
# ---------------------------------------------------------------------------
def init_generator_params(key, noise_dim, hidden_dims, output_dim, dtype=jnp.float32):
    """Unpadded params, layer shapes mirroring the PyTorch module."""
    dims = [noise_dim] + list(hidden_dims) + [output_dim]
    params = []
    for i in range(len(dims) - 1):
        key, wk, bk = jax.random.split(key, 3)
        bound = 1.0 / math.sqrt(dims[i])
        # Stored as [in, out] (transpose of PyTorch's [out, in]) for x @ W layout.
        w = jax.random.uniform(wk, (dims[i], dims[i + 1]), dtype, -bound, bound)
        b = jax.random.uniform(bk, (1, dims[i + 1]), dtype, -bound, bound)
        params.append((w, b))
    return params


def pad_generator_params(params, lane=LANE, weights_dtype=None):
    """Zero-pad hidden dims to multiples of 128; keep first-in / last-out dims real.

    Padded weight rows/cols and bias entries are zero, so padding never leaks
    into real outputs.  `weights_dtype=jnp.bfloat16` halves weight HBM traffic
    (biases stay f32).
    """
    n = len(params)
    padded = []
    prev_out_pad = params[0][0].shape[0]  # first layer input dim stays unpadded
    for i, (w, b) in enumerate(params):
        din, dout = w.shape
        din_pad = prev_out_pad
        dout_pad = dout if i == n - 1 else _round_up(dout, lane)
        wp = jnp.zeros((din_pad, dout_pad), w.dtype).at[:din, :dout].set(w)
        bp = jnp.zeros((1, dout_pad), b.dtype).at[:, :dout].set(b)
        if weights_dtype is not None:
            wp = wp.astype(weights_dtype)
        padded.append((wp, bp))
        prev_out_pad = dout_pad
    return padded


# ---------------------------------------------------------------------------
# Forward pass: one pallas_call for the entire MLP, gridded over batch tiles.
# ---------------------------------------------------------------------------
def generator_forward(padded_params, z, *, batch_tile=None):
    batch, noise_dim = z.shape
    n_layers = len(padded_params)
    assert padded_params[0][0].shape[0] == noise_dim
    output_dim = padded_params[-1][0].shape[1]

    if batch_tile is None:
        batch_tile, n_tiles = _choose_batch_tile(batch)
    else:
        n_tiles = -(-batch // batch_tile)
    padded_batch = batch_tile * n_tiles

    # Pad the batch dim only when needed (extra rows are sliced off below).
    zp = z if padded_batch == batch else jnp.pad(z, ((0, padded_batch - batch), (0, 0)))

    # Input block: full noise_dim on the lane axis (block dim == array dim -> legal),
    # no lane padding, 4x less input DMA than padding to 128.
    in_specs = [pl.BlockSpec((batch_tile, noise_dim), lambda i: (i, 0))]
    flat_inputs = [zp]
    for w, b in padded_params:
        # Constant index maps: weights/biases stay VMEM-resident across batch tiles.
        in_specs.append(pl.BlockSpec(w.shape, lambda i: (0, 0)))
        in_specs.append(pl.BlockSpec(b.shape, lambda i: (0, 0)))
        flat_inputs.append(w)
        flat_inputs.append(b)

    kernel = functools.partial(_fused_mlp_kernel, n_layers=n_layers)
    out = pl.pallas_call(
        kernel,
        out_shape=jax.ShapeDtypeStruct((padded_batch, output_dim), z.dtype),
        grid=(n_tiles,),
        in_specs=in_specs,
        # Output block covers the full (unpadded) output_dim: 8x fewer writeback
        # bytes than lane-padding to 128, and the per-tile HBM region is contiguous.
        out_specs=pl.BlockSpec((batch_tile, output_dim), lambda i: (i, 0)),
        compiler_params=pltpu.CompilerParams(
            dimension_semantics=("parallel",),
        ),
    )(*flat_inputs)

    return out if padded_batch == batch else out[:batch]


# ---------------------------------------------------------------------------
# Pure-JAX reference (unpadded params) for correctness checks.
# ---------------------------------------------------------------------------
def generator_reference(params, z):
    n_layers = len(params)
    x = z
    for i, (w, b) in enumerate(params):
        y = x @ w + b
        if i == n_layers - 1:
            x = jnp.maximum(y, 0.0)
        else:
            x = jnp.where(y > 0, y, 0.2 * y)
    return x


if __name__ == "__main__":
    noise_dim = 32
    hidden_dims = [64, 48]
    output_dim = 16

    key = jax.random.PRNGKey(0)
    pkey, zkey_small, zkey_big = jax.random.split(key, 3)

    params = init_generator_params(pkey, noise_dim, hidden_dims, output_dim)
    padded_f32 = pad_generator_params(params)

    # Small batch: single tile, grid=(1,).
    batch = 8
    z = jax.random.normal(zkey_small, (batch, noise_dim), jnp.float32)
    out = jax.block_until_ready(generator_forward(padded_f32, z))
    ref = generator_reference(params, z)
    assert out.shape == (batch, output_dim), out.shape
    assert jnp.allclose(out, ref, atol=1e-5, rtol=1e-5), (
        float(jnp.max(jnp.abs(out - ref)))
    )

    # Larger, non-aligned batch: batch padding + even 2-step parallel grid.
    batch_big = 300
    z_big = jax.random.normal(zkey_big, (batch_big, noise_dim), jnp.float32)
    out_big = jax.block_until_ready(generator_forward(padded_f32, z_big))
    ref_big = generator_reference(params, z_big)
    assert out_big.shape == (batch_big, output_dim), out_big.shape
    assert jnp.allclose(out_big, ref_big, atol=1e-5, rtol=1e-5), (
        float(jnp.max(jnp.abs(out_big - ref_big)))
    )

    # bf16 weight storage (v6e/v7x traffic optimization; MXU-operand-only cast,
    # activations stay f32).  Loose tolerance vs the f32 reference.
    padded_bf16 = pad_generator_params(params, weights_dtype=jnp.bfloat16)
    out_bf16 = jax.block_until_ready(generator_forward(padded_bf16, z_big))
    assert out_bf16.shape == (batch_big, output_dim), out_bf16.shape
    assert jnp.allclose(out_bf16, ref_big, atol=2e-1, rtol=2e-1), (
        float(jnp.max(jnp.abs(out_bf16 - ref_big)))
    )

    print("KERNEL_OK")
</pallas_src>

<mosaic_0001>
module attributes {stable_mosaic.version = 11 : i64} {
  func.func @_fused_mlp_kernel(%arg0: i32, %arg1: memref<8x32xf32, #tpu.memory_space<vmem>>, %arg2: memref<32x128xf32, #tpu.memory_space<vmem>>, %arg3: memref<1x128xf32, #tpu.memory_space<vmem>>, %arg4: memref<128x128xf32, #tpu.memory_space<vmem>>, %arg5: memref<1x128xf32, #tpu.memory_space<vmem>>, %arg6: memref<128x16xf32, #tpu.memory_space<vmem>>, %arg7: memref<1x16xf32, #tpu.memory_space<vmem>>, %arg8: memref<8x16xf32, #tpu.memory_space<vmem>>) attributes {dimension_semantics = [#tpu.dimension_semantics<parallel>], iteration_bounds = array<i64: 1>, scalar_prefetch = 0 : i64, scratch_operands = 0 : i64, tpu.core_type = #tpu.core_type<tc>, window_params = [{transform_indices = @transform_0, window_bounds = array<i64: 8, 32>}, {pipeline_mode = #tpu.pipeline_mode<synchronous>, transform_indices = @transform_1, window_bounds = array<i64: 32, 128>}, {pipeline_mode = #tpu.pipeline_mode<synchronous>, transform_indices = @transform_2, window_bounds = array<i64: 1, 128>}, {pipeline_mode = #tpu.pipeline_mode<synchronous>, transform_indices = @transform_3, window_bounds = array<i64: 128, 128>}, {pipeline_mode = #tpu.pipeline_mode<synchronous>, transform_indices = @transform_4, window_bounds = array<i64: 1, 128>}, {pipeline_mode = #tpu.pipeline_mode<synchronous>, transform_indices = @transform_5, window_bounds = array<i64: 128, 16>}, {pipeline_mode = #tpu.pipeline_mode<synchronous>, transform_indices = @transform_6, window_bounds = array<i64: 1, 16>}, {transform_indices = @transform_7, window_bounds = array<i64: 8, 16>}]} {
    %c0 = arith.constant 0 : index
    %c0_0 = arith.constant 0 : index
    %0 = vector.load %arg1[%c0, %c0_0] : memref<8x32xf32, #tpu.memory_space<vmem>>, vector<8x32xf32>
    %c0_1 = arith.constant 0 : index
    %c0_2 = arith.constant 0 : index
    %1 = vector.load %arg2[%c0_1, %c0_2] : memref<32x128xf32, #tpu.memory_space<vmem>>, vector<32x128xf32>
    %c0_3 = arith.constant 0 : index
    %c0_4 = arith.constant 0 : index
    %2 = vector.load %arg3[%c0_3, %c0_4] : memref<1x128xf32, #tpu.memory_space<vmem>>, vector<1x128xf32>
    %cst = arith.constant dense<0.000000e+00> : vector<8x128xf32>
    %3 = tpu.matmul %0, %1, %cst {dimension_numbers = #tpu.dot_dimension_numbers<[1], [0], [0], [1], [0, 0, 1, 1], [], []>} : vector<8x32xf32>, vector<32x128xf32>, vector<8x128xf32> -> vector<8x128xf32>
    %4 = vector.broadcast %2 : vector<1x128xf32> to vector<8x128xf32>
    %5 = arith.addf %3, %4 : vector<8x128xf32>
    %cst_5 = arith.constant 0.000000e+00 : f32
    %6 = vector.broadcast %cst_5 : f32 to vector<8x128xf32>
    %7 = arith.cmpf ogt, %5, %6 : vector<8x128xf32>
    %cst_6 = arith.constant 2.000000e-01 : f32
    %8 = vector.broadcast %cst_6 : f32 to vector<8x128xf32>
    %9 = arith.mulf %8, %5 : vector<8x128xf32>
    %10 = arith.select %7, %5, %9 : vector<8x128xi1>, vector<8x128xf32>
    %c0_7 = arith.constant 0 : index
    %c0_8 = arith.constant 0 : index
    %11 = vector.load %arg4[%c0_7, %c0_8] : memref<128x128xf32, #tpu.memory_space<vmem>>, vector<128x128xf32>
    %c0_9 = arith.constant 0 : index
    %c0_10 = arith.constant 0 : index
    %12 = vector.load %arg5[%c0_9, %c0_10] : memref<1x128xf32, #tpu.memory_space<vmem>>, vector<1x128xf32>
    %cst_11 = arith.constant dense<0.000000e+00> : vector<8x128xf32>
    %13 = tpu.matmul %10, %11, %cst_11 {dimension_numbers = #tpu.dot_dimension_numbers<[1], [0], [0], [1], [0, 0, 1, 1], [], []>} : vector<8x128xf32>, vector<128x128xf32>, vector<8x128xf32> -> vector<8x128xf32>
    %14 = vector.broadcast %12 : vector<1x128xf32> to vector<8x128xf32>
    %15 = arith.addf %13, %14 : vector<8x128xf32>
    %cst_12 = arith.constant 0.000000e+00 : f32
    %16 = vector.broadcast %cst_12 : f32 to vector<8x128xf32>
    %17 = arith.cmpf ogt, %15, %16 : vector<8x128xf32>
    %cst_13 = arith.constant 2.000000e-01 : f32
    %18 = vector.broadcast %cst_13 : f32 to vector<8x128xf32>
    %19 = arith.mulf %18, %15 : vector<8x128xf32>
    %20 = arith.select %17, %15, %19 : vector<8x128xi1>, vector<8x128xf32>
    %c0_14 = arith.constant 0 : index
    %c0_15 = arith.constant 0 : index
    %21 = vector.load %arg6[%c0_14, %c0_15] : memref<128x16xf32, #tpu.memory_space<vmem>>, vector<128x16xf32>
    %c0_16 = arith.constant 0 : index
    %c0_17 = arith.constant 0 : index
    %22 = vector.load %arg7[%c0_16, %c0_17] : memref<1x16xf32, #tpu.memory_space<vmem>>, vector<1x16xf32>
    %cst_18 = arith.constant dense<0.000000e+00> : vector<8x16xf32>
    %23 = tpu.matmul %20, %21, %cst_18 {dimension_numbers = #tpu.dot_dimension_numbers<[1], [0], [0], [1], [0, 0, 1, 1], [], []>} : vector<8x128xf32>, vector<128x16xf32>, vector<8x16xf32> -> vector<8x16xf32>
    %24 = vector.broadcast %22 : vector<1x16xf32> to vector<8x16xf32>
    %25 = arith.addf %23, %24 : vector<8x16xf32>
    %cst_19 = arith.constant 0.000000e+00 : f32
    %26 = vector.broadcast %cst_19 : f32 to vector<8x16xf32>
    %27 = arith.maximumf %25, %26 : vector<8x16xf32>
    %c0_20 = arith.constant 0 : index
    %c0_21 = arith.constant 0 : index
    %28 = vector.load %arg8[%c0_20, %c0_21] : memref<8x16xf32, #tpu.memory_space<vmem>>, vector<8x16xf32>
    tpu.vector_store %arg8[%c0_20, %c0_21], %27 {strides = array<i32>} : memref<8x16xf32, #tpu.memory_space<vmem>>, vector<8x16xf32>,
    return
  }
  func.func @transform_0(%arg0: i32) -> (i32, i32) {
    %c0_i32 = arith.constant 0 : i32
    %c0_i32_0 = arith.constant 0 : i32
    return %arg0, %c0_i32 : i32, i32
  }
  func.func @transform_1(%arg0: i32) -> (i32, i32) {
    %c0_i32 = arith.constant 0 : i32
    %c0_i32_0 = arith.constant 0 : i32
    %c0_i32_1 = arith.constant 0 : i32
    return %c0_i32, %c0_i32_0 : i32, i32
  }
  func.func @transform_2(%arg0: i32) -> (i32, i32) {
    %c0_i32 = arith.constant 0 : i32
    %c0_i32_0 = arith.constant 0 : i32
    %c0_i32_1 = arith.constant 0 : i32
    return %c0_i32, %c0_i32_0 : i32, i32
  }
  func.func @transform_3(%arg0: i32) -> (i32, i32) {
    %c0_i32 = arith.constant 0 : i32
    %c0_i32_0 = arith.constant 0 : i32
    %c0_i32_1 = arith.constant 0 : i32
    return %c0_i32, %c0_i32_0 : i32, i32
  }
  func.func @transform_4(%arg0: i32) -> (i32, i32) {
    %c0_i32 = arith.constant 0 : i32
    %c0_i32_0 = arith.constant 0 : i32
    %c0_i32_1 = arith.constant 0 : i32
    return %c0_i32, %c0_i32_0 : i32, i32
  }
  func.func @transform_5(%arg0: i32) -> (i32, i32) {
    %c0_i32 = arith.constant 0 : i32
    %c0_i32_0 = arith.constant 0 : i32
    %c0_i32_1 = arith.constant 0 : i32
    return %c0_i32, %c0_i32_0 : i32, i32
  }
  func.func @transform_6(%arg0: i32) -> (i32, i32) {
    %c0_i32 = arith.constant 0 : i32
    %c0_i32_0 = arith.constant 0 : i32
    %c0_i32_1 = arith.constant 0 : i32
    return %c0_i32, %c0_i32_0 : i32, i32
  }
  func.func @transform_7(%arg0: i32) -> (i32, i32) {
    %c0_i32 = arith.constant 0 : i32
    %c0_i32_0 = arith.constant 0 : i32
    return %arg0, %c0_i32 : i32, i32
  }
}

</mosaic_0001>

<bundles_post_ra>
// kernel: tpu_custom_call.1
= control target key start
LH: loop header
LB: loop body
LE: loop exit
PB: predicated region body
PF: predicated region fallthrough
CT: control target
= control target key end

     0   :  { %12 = vsyncpa [#allocation3], 0  ;;  %s770_s0 = inlined_call_operand.vmem [shape: f32[8,32], index: 0, kind: input, shape index: {}]   ;;  %s771_s1 = inlined_call_operand.hbm [shape: f32[32,128], index: 1, kind: input, shape index: {}]   ;;  %s772_s2 = inlined_call_operand.vmem [shape: f32[1,128], index: 2, kind: input, shape index: {}]   ;;  %s773_s3 = inlined_call_operand.vmem [shape: f32[128,128], index: 3, kind: input, shape index: {}]   ;;  %s774_s4 = inlined_call_operand.vmem [shape: f32[1,128], index: 4, kind: input, shape index: {}]   ;;  %s775_s5 = inlined_call_operand.vmem [shape: f32[128,16], index: 5, kind: input, shape index: {}]   ;;  %s776_s6 = inlined_call_operand.vmem [shape: f32[1,16], index: 6, kind: input, shape index: {}]   ;;  %s777_s7 = inlined_call_operand.hbm [shape: f32[8,16], index: 7, kind: output, shape index: {}]  }
   0x1   :  { %13 = vsyncpa [#allocation4], 0  ;;  %s570_s24 = smov [#allocation2]   ;;  %s522_s28 = scalar_lea.hbm %s771_s1, 512 }
   0x2   :  { %s21_s25 = sshll.u32 %s570_s24, 4  ;;  %p523_p0 = scmp.ne.s32.totalorder %s771_s1, %s522_s28  ;;  %s22_s25 = int_to_ptr.vmem [resolvable:$true] %s21_s25 }
   0x3   :  { %p526_p1 = scmp.lt.u32.totalorder %s522_s28, %s771_s1 }
   0x5   :  { %p528_p2 = pnand %p526_p1, %p523_p0 }
   0x7   :  { %531 = shalt.err (!%p528_p2)
}
   0x8   :  { %s532_s10 = scalar_lea.vmem %s22_s25, 512  ;;  %p537_p4 = scmp.lt.s32.totalorder %s22_s25, %s22_s25 }
   0x9   :  { %p533_p3 = scmp.ne.s32.totalorder %s22_s25, %s532_s10  ;;  %p538_p5 = scmp.lt.s32.totalorder %s532_s10, %s532_s10 }
   0xb   :  { %p539_p6 = por %p538_p5, %p537_p4 }
   0xd   :  { %p540_p7 = pnand %p539_p6, %p533_p3 }
   0xf   :  { %543 = shalt.err (!%p540_p7)
}
  0x10   :  { %s571_s11 = smov 128   ;;  %s572_s12 = smov 8  }
  0x11   :  { %27 = dma.hbm_to_vmem [thread:$0]  %s771_s1, 512, %s22_s25, [#allocation3], %s571_s11, %s571_s11, %s572_s12  }
  0x12   :  { %566 = dma.done.wait [#allocation3], 512  }
  0x13   :  { %567 = vsyncadd [#allocation3], 4294966784  ;;  %v573_v0 = vmov 0.0|0.0   ;;  %vm574_vm0 = vmmov 0   ;;  %v575_v1 = vmov 0.0   ;;  %v42_v2 = vld [vmem:[#allocation2] sm:$0xff] }
  0x14   :  { %461 = vmatprep.subr.bf16.mxu0 %v573_v0  ;;  %388 = vmatprep.mubr.msk.f32.mxu0 %vm574_vm0, %v575_v1  ;;  %v43_v3 = vld [vmem:[#allocation2 + $0x8] sm:$0xff]  ;;  %v44_v4 = vld [vmem:[#allocation2 + $0x10] sm:$0xff]  ;;  %v45_v6 = vld [vmem:[#allocation2 + $0x18] sm:$0xff]  ;;  %vm53_vm1 = vcmask 261120   ;;  %s576_s9 = smov [#allocation5]   ;;  %vm320_vm4 = vcmask 130048  }
  0x15   :  { %467 = vmatprep.subr.bf16.mxu1 %v573_v0  ;;  %423 = vmatprep.mubr.msk.f32.mxu1 %vm574_vm0, %v575_v1  ;;  %v462_v5 = vpack.c.bf16 %v43_v3, %v42_v2  ;;  %v130_v7 = vld [vmem:[%s773_s3] sm:$0xff]  ;;  %v131_v8 = vld [vmem:[%s773_s3 + $0x8] sm:$0xff]  ;;  %v132_v9 = vld [vmem:[%s773_s3 + $0x10] sm:$0xff]  ;;  %v465_v11 = vpack.c.bf16 %v45_v6, %v44_v4 }
  0x16   :  { %v133_v10 = vld [vmem:[%s773_s3 + $0x18] sm:$0xff]  ;;  %v468_v12 = vpack.c.bf16 %v131_v8, %v130_v7  ;;  %v134_v14 = vld [vmem:[%s773_s3 + $0x20] sm:$0xff]  ;;  %v135_v15 = vld [vmem:[%s773_s3 + $0x28] sm:$0xff] }
  0x17   :  { %463 = vmatpush3.bf16.msra.mxu0 %v462_v5  ;;  %v471_v13 = vpack.c.bf16 %v133_v10, %v132_v9  ;;  %v41_v16 = vld [vmem:[%s770_s0] sm:$0xff]  ;;  %v474_v17 = vpack.c.bf16 %v135_v15, %v134_v14  ;;  %v136_v18 = vld [vmem:[%s773_s3 + $0x30] sm:$0xff]  ;;  %v137_v19 = vld [vmem:[%s773_s3 + $0x38] sm:$0xff] }
  0x18   :  { %464 = vmatprep.subr.bf16.mxu0 %v573_v0  ;;  %469 = vmatpush3.bf16.msra.mxu1 %v468_v12  ;;  %v477_v20 = vpack.c.bf16 %v137_v19, %v136_v18  ;;  %v138_v21 = vld [vmem:[%s773_s3 + $0x40] sm:$0xff]  ;;  %v139_v22 = vld [vmem:[%s773_s3 + $0x48] sm:$0xff]  ;;  %v140_v24 = vld [vmem:[%s773_s3 + $0x50] sm:$0xff] }
  0x19   :  { %470 = vmatprep.subr.bf16.mxu1 %v573_v0  ;;  %v480_v23 = vpack.c.bf16 %v139_v22, %v138_v21  ;;  %v141_v25 = vld [vmem:[%s773_s3 + $0x58] sm:$0xff]  ;;  %v142_v27 = vld [vmem:[%s773_s3 + $0x60] sm:$0xff]  ;;  %v143_v28 = vld [vmem:[%s773_s3 + $0x68] sm:$0xff] }
  0x1a   :  { %v483_v26 = vpack.c.bf16 %v141_v25, %v140_v24  ;;  %v486_v29 = vpack.c.bf16 %v143_v28, %v142_v27  ;;  %v144_v30 = vld [vmem:[%s773_s3 + $0x70] sm:$0xff]  ;;  %v145_v31 = vld [vmem:[%s773_s3 + $0x78] sm:$0xff]  ;;  %v226_v33 = vld [vmem:[%s775_s5] sm:$0xff] }
  0x1b   :  { %466 = vmatpush3.bf16.msra.mxu0 %v465_v11  ;;  %v489_v32 = vpack.c.bf16 %v145_v31, %v144_v30  ;;  %v227_v34 = vld [vmem:[%s775_s5 + $0x8] sm:$0xff]  ;;  %v228_v35 = vld [vmem:[%s775_s5 + $0x10] sm:$0xff]  ;;  %v229_v37 = vld [vmem:[%s775_s5 + $0x18] sm:$0xff] }
  0x1c   :  { %491 = vmatprep.subr.bf16.mxu0 %v573_v0  ;;  %472 = vmatpush3.bf16.msra.mxu1 %v471_v13  ;;  %v492_v36 = vpack.c.bf16 %v227_v34, %v226_v33  ;;  %v495_v38 = vpack.c.bf16 %v229_v37, %v228_v35  ;;  %v230_v39 = vld [vmem:[%s775_s5 + $0x20] sm:$0xff]  ;;  %v231_v40 = vld [vmem:[%s775_s5 + $0x28] sm:$0xff]  ;;  %v232_v42 = vld [vmem:[%s775_s5 + $0x30] sm:$0xff] }
  0x1d   :  { %473 = vmatprep.subr.bf16.mxu1 %v573_v0  ;;  %v498_v41 = vpack.c.bf16 %v231_v40, %v230_v39  ;;  %v233_v43 = vld [vmem:[%s775_s5 + $0x38] sm:$0xff]  ;;  %v234_v45 = vld [vmem:[%s775_s5 + $0x40] sm:$0xff]  ;;  %v235_v46 = vld [vmem:[%s775_s5 + $0x48] sm:$0xff] }
  0x1e   :  { %389 = vmatmul.mubr.msk.f32.vlgmr.msra.gmra.mrb[0].mxu0 %vm53_vm1, %v41_v16  ;;  %v501_v44 = vpack.c.bf16 %v233_v43, %v232_v42  ;;  %v504_v47 = vpack.c.bf16 %v235_v46, %v234_v45  ;;  %v236_v48 = vld [vmem:[%s775_s5 + $0x50] sm:$0xff]  ;;  %v237_v49 = vld [vmem:[%s775_s5 + $0x58] sm:$0xff]  ;;  %v238_v51 = vld [vmem:[%s775_s5 + $0x60] sm:$0xff] }
  0x1f   :  { %458 = vmatprep.mubr.msk.f32.mxu0 %vm574_vm0, %v575_v1  ;;  %493 = vmatpush3.bf16.msra.mxu0 %v492_v36  ;;  %v507_v50 = vpack.c.bf16 %v237_v49, %v236_v48  ;;  %v239_v52 = vld [vmem:[%s775_s5 + $0x68] sm:$0xff]  ;;  %v337_v54 = vld [vmem:[%s772_s2] ss:$0 sm:$0xff]  ;;  %v240_v60 = vld [vmem:[%s775_s5 + $0x70] sm:$0xff] }
  0x20   :  { %475 = vmatpush3.bf16.msra.mxu1 %v474_v17  ;;  %494 = vmatprep.subr.bf16.mxu0 %v573_v0  ;;  %v510_v53 = vpack.c.bf16 %v239_v52, %v238_v51  ;;  %v241_v61 = vld [vmem:[%s775_s5 + $0x78] sm:$0xff]  ;;  %v339_v63 = vld [vmem:[%s774_s4] ss:$0 sm:$0xff]  ;;  %s328_s5 = sshll.u32 %s576_s9, 4  ;;  %s329_s5 = int_to_ptr.vmem [resolvable:$true] %s328_s5 }
  0x21   :  { %476 = vmatprep.subr.bf16.mxu1 %v573_v0  ;;  %v513_v62 = vpack.c.bf16 %v241_v61, %v240_v60  ;;  %v340_v5 = vld [vmem:[%s776_s6] ss:$0 sm:$0xff]  ;;  %s544_s4 = scalar_lea.vmem %s329_s5, 128  ;;  %p549_p9 = scmp.lt.s32.totalorder %s329_s5, %s329_s5 }
  0x22   :  { %p545_p8 = scmp.ne.s32.totalorder %s329_s5, %s544_s4  ;;  %p550_p10 = scmp.lt.s32.totalorder %s544_s4, %s544_s4 }
  0x23   :  { %496 = vmatpush3.bf16.msra.mxu0 %v495_v38 }
  0x24   :  { %478 = vmatpush3.bf16.msra.mxu1 %v477_v20  ;;  %497 = vmatprep.subr.bf16.mxu0 %v573_v0  ;;  %p551_p11 = por %p550_p10, %p549_p9 }
  0x25   :  { %479 = vmatprep.subr.bf16.mxu1 %v573_v0 }
  0x26   :  { %p552_p12 = pnand %p551_p11, %p545_p8 }
  0x27   :  { %499 = vmatpush3.bf16.msra.mxu0 %v498_v41 }
  0x28   :  { %481 = vmatpush3.bf16.msra.mxu1 %v480_v23  ;;  %500 = vmatprep.subr.bf16.mxu0 %v573_v0 }
  0x29   :  { %482 = vmatprep.subr.bf16.mxu1 %v573_v0 }
  0x2b   :  { %502 = vmatpush3.bf16.msra.mxu0 %v501_v44 }
  0x2c   :  { %484 = vmatpush3.bf16.msra.mxu1 %v483_v26  ;;  %503 = vmatprep.subr.bf16.mxu0 %v573_v0 }
  0x2d   :  { %485 = vmatprep.subr.bf16.mxu1 %v573_v0 }
  0x2f   :  { %505 = vmatpush3.bf16.msra.mxu0 %v504_v47 }
  0x30   :  { %487 = vmatpush3.bf16.msra.mxu1 %v486_v29  ;;  %506 = vmatprep.subr.bf16.mxu0 %v573_v0 }
  0x31   :  { %488 = vmatprep.subr.bf16.mxu1 %v573_v0 }
  0x33   :  { %508 = vmatpush3.bf16.msra.mxu0 %v507_v50 }
  0x34   :  { %490 = vmatpush3.bf16.msra.mxu1 %v489_v32  ;;  %509 = vmatprep.subr.bf16.mxu0 %v573_v0 }
  0x37   :  { %511 = vmatpush3.bf16.msra.mxu0 %v510_v53 }
  0x38   :  { %512 = vmatprep.subr.bf16.mxu0 %v573_v0 }
  0x3b   :  { %514 = vmatpush3.bf16.msra.mxu0 %v513_v62 }
  0xf1   :  { %v123_v55 = vpop.f32.mrb[0].mxu0 }
  0xf2   :  { %v124_v56 = vadd.f32 %v337_v54, %v123_v55  ;;  %v390_v57 = vpop.f32.mrb[1].mxu0 }
  0xf4   :  { %v128_v58 = vmul.f32 0.2, %v124_v56  ;;  %vm127_vm2 = vcmp.gt.f32.partialorder %v124_v56, 0.0 }
  0xf6   :  { %v129_v59 = vsel %vm127_vm2, %v124_v56, %v128_v58 }
  0xf7   :  { %424 = vmatmul.mubr.f32.vlgmr.msra.gmra.mrb[0].mxu1 %v129_v59 }
 0x1ca   :  { %v219_v0 = vpop.f32.mrb[0].mxu1 }
 0x1cb   :  { %v220_v1 = vadd.f32 %v339_v63, %v219_v0  ;;  %v425_v2 = vpop.f32.mrb[1].mxu1 }
 0x1cd   :  { %vm223_vm3 = vcmp.gt.f32.partialorder %v220_v1, 0.0  ;;  %v224_v3 = vmul.f32 0.2, %v220_v1 }
 0x1cf   :  { %v225_v4 = vsel %vm223_vm3, %v220_v1, %v224_v3 }
 0x1d0   :  { %459 = vmatmul.mubr.f32.vlgmr.msra.gmra.mrb[2].mxu0 %v225_v4 }
 0x2a3   :  { %v315_v6 = vpop.f32.mrb[2].mxu0 }
 0x2a4   :  { %v316_v7 = vadd.f32 %v340_v5, %v315_v6  ;;  %v460_v8 = vpop.f32.mrb[3].mxu0 }
 0x2a6   :  { %v319_v9 = vmax.f32 %v316_v7, 0.0 }
 0x2a8   :  { %321 = vst.msk [vmem:[#allocation5] sm:$0xff] %vm320_vm4, %v319_v9 }
 0x2a9   :  { %555 = shalt.err (!%p552_p12)
}
 0x2aa   :  { %s556_s6 = scalar_lea.hbm %s777_s7, 128 }
 0x2ab   :  { %p557_p13 = scmp.ne.s32.totalorder %s777_s7, %s556_s6  ;;  %p560_p0 = scmp.lt.u32.totalorder %s556_s6, %s777_s7 }
 0x2ad   :  { %p562_p1 = pnand %p560_p0, %p557_p13 }
 0x2af   :  { %565 = shalt.err (!%p562_p1)
}
 0x2b0   :  { %331 = dma.vmem_to_hbm [thread:$0]  %s329_s5, 128, %s777_s7, [#allocation4]  }
 0x2b1   :  { %568 = dma.done.wait [#allocation4], 128  }
 0x2b2   :  { %569 = vsyncadd [#allocation4], 4294967168 }
 0x2b3   :  { %335 = vsyncpa [#allocation3], 1 }
 0x2b4   :  { %336 = vsyncpa [#allocation4], 1 }

</bundles_post_ra>
